<compile_context>
chip_gen: v7x
topology: tpu7x:2x2x1
jax: 0.10.0
libtpu: 0.0.40
codegen_flags: <defaults>
</compile_context>

<pallas_src>
import functools

import jax
import jax.numpy as jnp
from jax.experimental import pallas as pl
from jax.experimental.pallas import tpu as pltpu

NEG_SLOPE = 0.01   # torch.nn.LeakyReLU default negative_slope
_LANE = 128        # lane width (last dim)
_SUBLANE = 8       # f32 sublane width (second-to-last dim)


def _round_up(v, m):
    return (v + m - 1) // m * m


def _leaky_relu(x):
    # max(x, a*x) == LeakyReLU(x) for 0 < a < 1; mul+max instead of mul+cmp+select.
    return jnp.maximum(x, NEG_SLOPE * x)


def mlp_kernel(x_ref, w1_ref, b1_ref, w2_ref, b2_ref, w3_ref, b3_ref, o_ref,
               *, compute_dtype):
    # Matmul operands in `compute_dtype` (f32 or bf16); accumulation, bias add
    # and LeakyReLU always in f32 (keeps v5e's f32-only VPU path cheap).
    x = x_ref[...].astype(compute_dtype)
    h = jnp.dot(x, w1_ref[...], preferred_element_type=jnp.float32) + b1_ref[...]
    h = _leaky_relu(h)
    h = jnp.dot(h.astype(compute_dtype), w2_ref[...],
                preferred_element_type=jnp.float32) + b2_ref[...]
    h = _leaky_relu(h)
    out = jnp.dot(h.astype(compute_dtype), w3_ref[...],
                  preferred_element_type=jnp.float32) + b3_ref[...]
    o_ref[...] = out.astype(o_ref.dtype)


def _pad2d(a, rows, cols):
    """Zero-pad a 2-D array up to (rows, cols)."""
    pr, pc = rows - a.shape[0], cols - a.shape[1]
    if pr == 0 and pc == 0:
        return a
    return jnp.pad(a, ((0, pr), (0, pc)))


@functools.partial(jax.jit, static_argnames=("block_b", "use_bf16"))
def mlp_forward(x, w1, b1, w2, b2, w3, b3, *, block_b=512, use_bf16=False):
    """x: (B, num_i); w*: (in, out); b*: (1, out). Returns (B, num_o)."""
    B, num_i = x.shape
    num_h = w1.shape[1]
    num_o = w3.shape[1]

    # keep the batch tile a legal sublane multiple regardless of caller input
    block_b = max(_round_up(block_b, _SUBLANE), _SUBLANE)

    # Hidden (lane) dim padded once; weights are read once per call and stay
    # VMEM-resident, so the extra bytes are negligible while keeping the
    # intermediate activations lane-aligned.  x / out stay unpadded.
    H = _round_up(num_h, _LANE)

    # --- batch tiling: small padding waste, >=2 tiles when possible (v7x) ---
    B8 = _round_up(B, _SUBLANE)
    nb = pl.cdiv(B8, block_b)
    if nb == 1 and B8 >= 2 * _SUBLANE:
        nb = 2  # give v7x's two TensorCores work; ~free on v5e/v6e
    tile_b = _round_up(pl.cdiv(B8, nb), _SUBLANE)
    nb = pl.cdiv(B8, tile_b)
    Bp = nb * tile_b

    xp = x if Bp == B else jnp.pad(x, ((0, Bp - B), (0, 0)))

    compute_dtype = jnp.bfloat16 if use_bf16 else x.dtype
    # zero-padded weight cols/rows are inert (LeakyReLU(0) == 0)
    w1p = _pad2d(w1, num_i, H).astype(compute_dtype)
    b1p = _pad2d(b1, 1, H)
    w2p = _pad2d(w2, H, H).astype(compute_dtype)
    b2p = _pad2d(b2, 1, H)
    w3p = _pad2d(w3, H, num_o).astype(compute_dtype)
    b3p = b3

    # weights/biases: VMEM-resident across batch tiles, single-buffered
    def resident(arr):
        return pl.BlockSpec(arr.shape, lambda i: (0, 0),
                            pipeline_mode=pl.Buffered(1))

    dsz = jnp.dtype(x.dtype).itemsize
    wsz = jnp.dtype(compute_dtype).itemsize
    weight_elems = num_i * H + H * H + H * num_o
    flops = 2 * Bp * weight_elems
    bytes_accessed = (dsz * Bp * (num_i + num_o)          # x in, out
                      + wsz * weight_elems                # weights (once)
                      + 4 * (2 * H + num_o))              # biases (once)

    # VMEM budget: resident weights (single-buffered) + double-buffered
    # x/out tiles + f32 intermediates; cap below physical VMEM per generation.
    needed = (wsz * weight_elems + 4 * (2 * H + num_o)
              + 2 * dsz * tile_b * (num_i + num_o)
              + 2 * 4 * tile_b * H)
    try:
        vmem_cap = pltpu.get_tpu_info().vmem_capacity_bytes
    except Exception:
        vmem_cap = 64 << 20
    vmem_limit = int(min(max(int(1.5 * needed), 32 << 20), int(0.75 * vmem_cap)))

    out_p = pl.pallas_call(
        functools.partial(mlp_kernel, compute_dtype=compute_dtype),
        out_shape=jax.ShapeDtypeStruct((Bp, num_o), x.dtype),
        grid=(nb,),
        in_specs=[
            pl.BlockSpec((tile_b, num_i), lambda i: (i, 0)),  # x: batch-tiled, unpadded lanes
            resident(w1p), resident(b1p),
            resident(w2p), resident(b2p),
            resident(w3p), resident(b3p),
        ],
        out_specs=pl.BlockSpec((tile_b, num_o), lambda i: (i, 0)),  # unpadded lanes
        compiler_params=pltpu.CompilerParams(
            dimension_semantics=("parallel",),
            vmem_limit_bytes=vmem_limit,
        ),
        cost_estimate=pl.CostEstimate(
            flops=flops, transcendentals=0, bytes_accessed=bytes_accessed
        ),
    )(xp, w1p, b1p, w2p, b2p, w3p, b3p)

    # strip batch padding only (no lane padding on the output)
    return out_p if Bp == B else out_p[:B]


# ---------------------------------------------------------------------------
# init helpers (match the PyTorch module's initialization) + reference
# ---------------------------------------------------------------------------
def xavier_uniform(key, fan_in, fan_out, dtype=jnp.float32):
    # matches torch.nn.init.xavier_uniform_ (gain=1.0)
    limit = (6.0 / (fan_in + fan_out)) ** 0.5
    return jax.random.uniform(key, (fan_in, fan_out), dtype,
                              minval=-limit, maxval=limit)


def linear_bias(key, fan_in, fan_out, dtype=jnp.float32):
    # matches torch.nn.Linear default bias init: U(-1/sqrt(fan_in), 1/sqrt(fan_in))
    bound = 1.0 / (fan_in ** 0.5)
    return jax.random.uniform(key, (1, fan_out), dtype,
                              minval=-bound, maxval=bound)


def mlp_reference(x, w1, b1, w2, b2, w3, b3):
    h = _leaky_relu(x @ w1 + b1)
    h = _leaky_relu(h @ w2 + b2)
    return h @ w3 + b3


if __name__ == "__main__":
    # small shapes implied by the module: batch=8, num_i=32, num_h=64, num_o=16
    B, num_i, num_h, num_o = 8, 32, 64, 16

    key = jax.random.PRNGKey(0)
    kx, kw1, kb1, kw2, kb2, kw3, kb3 = jax.random.split(key, 7)

    x = jax.random.normal(kx, (B, num_i), jnp.float32)
    w1 = xavier_uniform(kw1, num_i, num_h)
    b1 = linear_bias(kb1, num_i, num_h)
    w2 = xavier_uniform(kw2, num_h, num_h)
    b2 = linear_bias(kb2, num_h, num_h)
    w3 = xavier_uniform(kw3, num_h, num_o)
    b3 = linear_bias(kb3, num_h, num_o)

    out = jax.block_until_ready(mlp_forward(x, w1, b1, w2, b2, w3, b3))
    ref = mlp_reference(x, w1, b1, w2, b2, w3, b3)
    assert out.shape == (B, num_o)
    assert jnp.allclose(out, ref, atol=1e-5, rtol=1e-5)

    # multi-tile batch path (B > tile_b, non-multiple of tile) validates the grid
    B2 = 600
    x2 = jax.random.normal(jax.random.PRNGKey(1), (B2, num_i), jnp.float32)
    out2 = jax.block_until_ready(mlp_forward(x2, w1, b1, w2, b2, w3, b3))
    ref2 = mlp_reference(x2, w1, b1, w2, b2, w3, b3)
    assert out2.shape == (B2, num_o)
    assert jnp.allclose(out2, ref2, atol=1e-5, rtol=1e-5)

    # optional bf16 matmul path (v6e/v7x MXU-friendly); looser tolerance
    out_bf = jax.block_until_ready(
        mlp_forward(x2, w1, b1, w2, b2, w3, b3, use_bf16=True))
    assert out_bf.shape == (B2, num_o)
    assert jnp.allclose(out_bf, ref2, atol=5e-2, rtol=5e-2)

    print("KERNEL_OK")
</pallas_src>

<mosaic_0001>
module attributes {stable_mosaic.version = 11 : i64} {
  func.func @mlp_kernel(%arg0: i32, %arg1: memref<8x32xf32, #tpu.memory_space<vmem>>, %arg2: memref<32x128xf32, #tpu.memory_space<vmem>>, %arg3: memref<1x128xf32, #tpu.memory_space<vmem>>, %arg4: memref<128x128xf32, #tpu.memory_space<vmem>>, %arg5: memref<1x128xf32, #tpu.memory_space<vmem>>, %arg6: memref<128x16xf32, #tpu.memory_space<vmem>>, %arg7: memref<1x16xf32, #tpu.memory_space<vmem>>, %arg8: memref<8x16xf32, #tpu.memory_space<vmem>>) attributes {dimension_semantics = [#tpu.dimension_semantics<parallel>], iteration_bounds = array<i64: 1>, scalar_prefetch = 0 : i64, scratch_operands = 0 : i64, tpu.core_type = #tpu.core_type<tc>, window_params = [{transform_indices = @transform_0, window_bounds = array<i64: 8, 32>}, {pipeline_mode = #tpu.pipeline_mode<synchronous>, transform_indices = @transform_1, window_bounds = array<i64: 32, 128>}, {pipeline_mode = #tpu.pipeline_mode<synchronous>, transform_indices = @transform_2, window_bounds = array<i64: 1, 128>}, {pipeline_mode = #tpu.pipeline_mode<synchronous>, transform_indices = @transform_3, window_bounds = array<i64: 128, 128>}, {pipeline_mode = #tpu.pipeline_mode<synchronous>, transform_indices = @transform_4, window_bounds = array<i64: 1, 128>}, {pipeline_mode = #tpu.pipeline_mode<synchronous>, transform_indices = @transform_5, window_bounds = array<i64: 128, 16>}, {pipeline_mode = #tpu.pipeline_mode<synchronous>, transform_indices = @transform_6, window_bounds = array<i64: 1, 16>}, {transform_indices = @transform_7, window_bounds = array<i64: 8, 16>}]} {
    %c0 = arith.constant 0 : index
    %c0_0 = arith.constant 0 : index
    %0 = vector.load %arg1[%c0, %c0_0] : memref<8x32xf32, #tpu.memory_space<vmem>>, vector<8x32xf32>
    %c0_1 = arith.constant 0 : index
    %c0_2 = arith.constant 0 : index
    %1 = vector.load %arg2[%c0_1, %c0_2] : memref<32x128xf32, #tpu.memory_space<vmem>>, vector<32x128xf32>
    %cst = arith.constant dense<0.000000e+00> : vector<8x128xf32>
    %2 = tpu.matmul %0, %1, %cst {dimension_numbers = #tpu.dot_dimension_numbers<[1], [0], [0], [1], [0, 0, 1, 1], [], []>} : vector<8x32xf32>, vector<32x128xf32>, vector<8x128xf32> -> vector<8x128xf32>
    %c0_3 = arith.constant 0 : index
    %c0_4 = arith.constant 0 : index
    %3 = vector.load %arg3[%c0_3, %c0_4] : memref<1x128xf32, #tpu.memory_space<vmem>>, vector<1x128xf32>
    %4 = vector.broadcast %3 : vector<1x128xf32> to vector<8x128xf32>
    %5 = arith.addf %2, %4 : vector<8x128xf32>
    %cst_5 = arith.constant 0.00999999977 : f32
    %6 = vector.broadcast %cst_5 : f32 to vector<8x128xf32>
    %7 = arith.mulf %6, %5 : vector<8x128xf32>
    %8 = arith.maximumf %5, %7 : vector<8x128xf32>
    %c0_6 = arith.constant 0 : index
    %c0_7 = arith.constant 0 : index
    %9 = vector.load %arg4[%c0_6, %c0_7] : memref<128x128xf32, #tpu.memory_space<vmem>>, vector<128x128xf32>
    %cst_8 = arith.constant dense<0.000000e+00> : vector<8x128xf32>
    %10 = tpu.matmul %8, %9, %cst_8 {dimension_numbers = #tpu.dot_dimension_numbers<[1], [0], [0], [1], [0, 0, 1, 1], [], []>} : vector<8x128xf32>, vector<128x128xf32>, vector<8x128xf32> -> vector<8x128xf32>
    %c0_9 = arith.constant 0 : index
    %c0_10 = arith.constant 0 : index
    %11 = vector.load %arg5[%c0_9, %c0_10] : memref<1x128xf32, #tpu.memory_space<vmem>>, vector<1x128xf32>
    %12 = vector.broadcast %11 : vector<1x128xf32> to vector<8x128xf32>
    %13 = arith.addf %10, %12 : vector<8x128xf32>
    %cst_11 = arith.constant 0.00999999977 : f32
    %14 = vector.broadcast %cst_11 : f32 to vector<8x128xf32>
    %15 = arith.mulf %14, %13 : vector<8x128xf32>
    %16 = arith.maximumf %13, %15 : vector<8x128xf32>
    %c0_12 = arith.constant 0 : index
    %c0_13 = arith.constant 0 : index
    %17 = vector.load %arg6[%c0_12, %c0_13] : memref<128x16xf32, #tpu.memory_space<vmem>>, vector<128x16xf32>
    %cst_14 = arith.constant dense<0.000000e+00> : vector<8x16xf32>
    %18 = tpu.matmul %16, %17, %cst_14 {dimension_numbers = #tpu.dot_dimension_numbers<[1], [0], [0], [1], [0, 0, 1, 1], [], []>} : vector<8x128xf32>, vector<128x16xf32>, vector<8x16xf32> -> vector<8x16xf32>
    %c0_15 = arith.constant 0 : index
    %c0_16 = arith.constant 0 : index
    %19 = vector.load %arg7[%c0_15, %c0_16] : memref<1x16xf32, #tpu.memory_space<vmem>>, vector<1x16xf32>
    %20 = vector.broadcast %19 : vector<1x16xf32> to vector<8x16xf32>
    %21 = arith.addf %18, %20 : vector<8x16xf32>
    %c0_17 = arith.constant 0 : index
    %c0_18 = arith.constant 0 : index
    %22 = vector.load %arg8[%c0_17, %c0_18] : memref<8x16xf32, #tpu.memory_space<vmem>>, vector<8x16xf32>
    tpu.vector_store %arg8[%c0_17, %c0_18], %21 {strides = array<i32>} : memref<8x16xf32, #tpu.memory_space<vmem>>, vector<8x16xf32>,
    return
  }
  func.func @transform_0(%arg0: i32) -> (i32, i32) {
    %c0_i32 = arith.constant 0 : i32
    %c0_i32_0 = arith.constant 0 : i32
    return %arg0, %c0_i32 : i32, i32
  }
  func.func @transform_1(%arg0: i32) -> (i32, i32) {
    %c0_i32 = arith.constant 0 : i32
    %c0_i32_0 = arith.constant 0 : i32
    %c0_i32_1 = arith.constant 0 : i32
    return %c0_i32, %c0_i32_0 : i32, i32
  }
  func.func @transform_2(%arg0: i32) -> (i32, i32) {
    %c0_i32 = arith.constant 0 : i32
    %c0_i32_0 = arith.constant 0 : i32
    %c0_i32_1 = arith.constant 0 : i32
    return %c0_i32, %c0_i32_0 : i32, i32
  }
  func.func @transform_3(%arg0: i32) -> (i32, i32) {
    %c0_i32 = arith.constant 0 : i32
    %c0_i32_0 = arith.constant 0 : i32
    %c0_i32_1 = arith.constant 0 : i32
    return %c0_i32, %c0_i32_0 : i32, i32
  }
  func.func @transform_4(%arg0: i32) -> (i32, i32) {
    %c0_i32 = arith.constant 0 : i32
    %c0_i32_0 = arith.constant 0 : i32
    %c0_i32_1 = arith.constant 0 : i32
    return %c0_i32, %c0_i32_0 : i32, i32
  }
  func.func @transform_5(%arg0: i32) -> (i32, i32) {
    %c0_i32 = arith.constant 0 : i32
    %c0_i32_0 = arith.constant 0 : i32
    %c0_i32_1 = arith.constant 0 : i32
    return %c0_i32, %c0_i32_0 : i32, i32
  }
  func.func @transform_6(%arg0: i32) -> (i32, i32) {
    %c0_i32 = arith.constant 0 : i32
    %c0_i32_0 = arith.constant 0 : i32
    %c0_i32_1 = arith.constant 0 : i32
    return %c0_i32, %c0_i32_0 : i32, i32
  }
  func.func @transform_7(%arg0: i32) -> (i32, i32) {
    %c0_i32 = arith.constant 0 : i32
    %c0_i32_0 = arith.constant 0 : i32
    return %arg0, %c0_i32 : i32, i32
  }
}

</mosaic_0001>

<bundles_post_ra>
// kernel: mlp_forward.1
= control target key start
LH: loop header
LB: loop body
LE: loop exit
PB: predicated region body
PF: predicated region fallthrough
CT: control target
= control target key end

     0   :  { %v525_v3 = vmov 0.0|0.0   ;;  %vm526_vm0 = vmmov 0   ;;  %v527_v6 = vmov 0.0   ;;  %s722_s0 = inlined_call_operand.vmem [shape: f32[8,32], index: 0, kind: input, shape index: {}]   ;;  %s723_s1 = inlined_call_operand.vmem [shape: f32[32,128], index: 1, kind: input, shape index: {}]   ;;  %s724_s2 = inlined_call_operand.vmem [shape: f32[1,128], index: 2, kind: input, shape index: {}]   ;;  %s725_s3 = inlined_call_operand.vmem [shape: f32[128,128], index: 3, kind: input, shape index: {}]   ;;  %s726_s4 = inlined_call_operand.vmem [shape: f32[1,128], index: 4, kind: input, shape index: {}]   ;;  %s727_s5 = inlined_call_operand.vmem [shape: f32[128,16], index: 5, kind: input, shape index: {}]   ;;  %s728_s6 = inlined_call_operand.vmem [shape: f32[1,16], index: 6, kind: input, shape index: {}]   ;;  %s729_s7 = inlined_call_operand.hbm [shape: f32[8,16], index: 7, kind: output, shape index: {}]  }
   0x1   :  { %v28_v0 = vld [vmem:[%s723_s1] sm:$0xff]  ;;  %v29_v1 = vld [vmem:[%s723_s1 + $0x8] sm:$0xff]  ;;  %v30_v2 = vld [vmem:[%s723_s1 + $0x10] sm:$0xff]  ;;  %443 = vmatprep.subr.bf16.mxu0 %v525_v3  ;;  %370 = vmatprep.mubr.msk.f32.mxu0 %vm526_vm0, %v527_v6 }
   0x2   :  { %v444_v4 = vpack.c.bf16 %v29_v1, %v28_v0  ;;  %v31_v5 = vld [vmem:[%s723_s1 + $0x18] sm:$0xff]  ;;  %v115_v7 = vld [vmem:[%s725_s3] sm:$0xff]  ;;  %449 = vmatprep.subr.bf16.mxu1 %v525_v3  ;;  %v116_v8 = vld [vmem:[%s725_s3 + $0x8] sm:$0xff]  ;;  %405 = vmatprep.mubr.msk.f32.mxu1 %vm526_vm0, %v527_v6 }
   0x3   :  { %v117_v9 = vld [vmem:[%s725_s3 + $0x10] sm:$0xff]  ;;  %v118_v10 = vld [vmem:[%s725_s3 + $0x18] sm:$0xff]  ;;  %v447_v11 = vpack.c.bf16 %v31_v5, %v30_v2  ;;  %v450_v12 = vpack.c.bf16 %v116_v8, %v115_v7  ;;  %v119_v14 = vld [vmem:[%s725_s3 + $0x20] sm:$0xff] }
   0x4   :  { %445 = vmatpush3.bf16.msra.mxu0 %v444_v4  ;;  %v453_v13 = vpack.c.bf16 %v118_v10, %v117_v9  ;;  %v120_v15 = vld [vmem:[%s725_s3 + $0x28] sm:$0xff] }
   0x5   :  { %446 = vmatprep.subr.bf16.mxu0 %v525_v3  ;;  %451 = vmatpush3.bf16.msra.mxu1 %v450_v12 }
   0x6   :  { %452 = vmatprep.subr.bf16.mxu1 %v525_v3 }
   0x7   :  { %12 = vsyncpa [#allocation3], 0  ;;  %v27_v16 = vld [vmem:[%s722_s0] sm:$0xff]  ;;  %vm39_vm1 = vcmask 261120   ;;  %v456_v17 = vpack.c.bf16 %v120_v15, %v119_v14  ;;  %v121_v18 = vld [vmem:[%s725_s3 + $0x30] sm:$0xff]  ;;  %s528_s26 = smov [#allocation2]  }
   0x8   :  { %448 = vmatpush3.bf16.msra.mxu0 %v447_v11  ;;  %v122_v19 = vld [vmem:[%s725_s3 + $0x38] sm:$0xff]  ;;  %v123_v21 = vld [vmem:[%s725_s3 + $0x40] sm:$0xff]  ;;  %v124_v22 = vld [vmem:[%s725_s3 + $0x48] sm:$0xff]  ;;  %s311_s27 = sshll.u32 %s528_s26, 4  ;;  %vm303_vm2 = vcmask 130048   ;;  %s312_s27 = int_to_ptr.vmem [resolvable:$true] %s311_s27 }
   0x9   :  { %473 = vmatprep.subr.bf16.mxu0 %v525_v3  ;;  %454 = vmatpush3.bf16.msra.mxu1 %v453_v13  ;;  %v459_v20 = vpack.c.bf16 %v122_v19, %v121_v18  ;;  %v462_v23 = vpack.c.bf16 %v124_v22, %v123_v21  ;;  %v125_v24 = vld [vmem:[%s725_s3 + $0x50] sm:$0xff]  ;;  %v126_v25 = vld [vmem:[%s725_s3 + $0x58] sm:$0xff]  ;;  %v127_v27 = vld [vmem:[%s725_s3 + $0x60] sm:$0xff]  ;;  %p506_p1 = scmp.lt.s32.totalorder %s312_s27, %s312_s27 }
   0xa   :  { %455 = vmatprep.subr.bf16.mxu1 %v525_v3  ;;  %v465_v26 = vpack.c.bf16 %v126_v25, %v125_v24  ;;  %v128_v28 = vld [vmem:[%s725_s3 + $0x68] sm:$0xff]  ;;  %v129_v30 = vld [vmem:[%s725_s3 + $0x70] sm:$0xff]  ;;  %v130_v31 = vld [vmem:[%s725_s3 + $0x78] sm:$0xff] }
   0xb   :  { %371 = vmatmul.mubr.msk.f32.vlgmr.msra.gmra.mrb[0].mxu0 %vm39_vm1, %v27_v16  ;;  %v468_v29 = vpack.c.bf16 %v128_v28, %v127_v27  ;;  %v471_v32 = vpack.c.bf16 %v130_v31, %v129_v30  ;;  %v210_v33 = vld [vmem:[%s727_s5] sm:$0xff]  ;;  %v211_v34 = vld [vmem:[%s727_s5 + $0x8] sm:$0xff]  ;;  %v212_v35 = vld [vmem:[%s727_s5 + $0x10] sm:$0xff] }
   0xc   :  { %440 = vmatprep.mubr.msk.f32.mxu0 %vm526_vm0, %v527_v6  ;;  %v474_v36 = vpack.c.bf16 %v211_v34, %v210_v33  ;;  %v213_v37 = vld [vmem:[%s727_s5 + $0x18] sm:$0xff]  ;;  %v214_v39 = vld [vmem:[%s727_s5 + $0x20] sm:$0xff]  ;;  %v215_v40 = vld [vmem:[%s727_s5 + $0x28] sm:$0xff] }
   0xd   :  { %457 = vmatpush3.bf16.msra.mxu1 %v456_v17  ;;  %v477_v38 = vpack.c.bf16 %v213_v37, %v212_v35  ;;  %v480_v41 = vpack.c.bf16 %v215_v40, %v214_v39  ;;  %v216_v42 = vld [vmem:[%s727_s5 + $0x30] sm:$0xff]  ;;  %v217_v43 = vld [vmem:[%s727_s5 + $0x38] sm:$0xff]  ;;  %v218_v45 = vld [vmem:[%s727_s5 + $0x40] sm:$0xff] }
   0xe   :  { %458 = vmatprep.subr.bf16.mxu1 %v525_v3  ;;  %475 = vmatpush3.bf16.msra.mxu0 %v474_v36  ;;  %v483_v44 = vpack.c.bf16 %v217_v43, %v216_v42  ;;  %v219_v46 = vld [vmem:[%s727_s5 + $0x48] sm:$0xff]  ;;  %v220_v48 = vld [vmem:[%s727_s5 + $0x50] sm:$0xff]  ;;  %v221_v49 = vld [vmem:[%s727_s5 + $0x58] sm:$0xff] }
   0xf   :  { %476 = vmatprep.subr.bf16.mxu0 %v525_v3  ;;  %v486_v47 = vpack.c.bf16 %v219_v46, %v218_v45  ;;  %v489_v50 = vpack.c.bf16 %v221_v49, %v220_v48  ;;  %v319_v51 = vld [vmem:[%s724_s2] ss:$0 sm:$0xff]  ;;  %v223_v58 = vld [vmem:[%s727_s5 + $0x68] sm:$0xff]  ;;  %v224_v60 = vld [vmem:[%s727_s5 + $0x70] sm:$0xff] }
  0x10   :  { %v222_v57 = vld [vmem:[%s727_s5 + $0x60] sm:$0xff]  ;;  %v225_v61 = vld [vmem:[%s727_s5 + $0x78] sm:$0xff]  ;;  %s501_s5 = scalar_lea.vmem %s312_s27, 128 }
  0x11   :  { %460 = vmatpush3.bf16.msra.mxu1 %v459_v20  ;;  %v492_v59 = vpack.c.bf16 %v223_v58, %v222_v57  ;;  %v495_v62 = vpack.c.bf16 %v225_v61, %v224_v60  ;;  %v321_v63 = vld [vmem:[%s726_s4] ss:$0 sm:$0xff]  ;;  %p502_p0 = scmp.ne.s32.totalorder %s312_s27, %s501_s5  ;;  %p507_p2 = scmp.lt.s32.totalorder %s501_s5, %s501_s5 }
  0x12   :  { %461 = vmatprep.subr.bf16.mxu1 %v525_v3  ;;  %478 = vmatpush3.bf16.msra.mxu0 %v477_v38 }
  0x13   :  { %479 = vmatprep.subr.bf16.mxu0 %v525_v3  ;;  %p508_p3 = por %p507_p2, %p506_p1 }
  0x15   :  { %463 = vmatpush3.bf16.msra.mxu1 %v462_v23  ;;  %p509_p4 = pnand %p508_p3, %p502_p0 }
  0x16   :  { %464 = vmatprep.subr.bf16.mxu1 %v525_v3  ;;  %481 = vmatpush3.bf16.msra.mxu0 %v480_v41 }
  0x17   :  { %482 = vmatprep.subr.bf16.mxu0 %v525_v3 }
  0x19   :  { %466 = vmatpush3.bf16.msra.mxu1 %v465_v26 }
  0x1a   :  { %467 = vmatprep.subr.bf16.mxu1 %v525_v3  ;;  %484 = vmatpush3.bf16.msra.mxu0 %v483_v44 }
  0x1b   :  { %485 = vmatprep.subr.bf16.mxu0 %v525_v3 }
  0x1d   :  { %469 = vmatpush3.bf16.msra.mxu1 %v468_v29 }
  0x1e   :  { %470 = vmatprep.subr.bf16.mxu1 %v525_v3  ;;  %487 = vmatpush3.bf16.msra.mxu0 %v486_v47 }
  0x1f   :  { %488 = vmatprep.subr.bf16.mxu0 %v525_v3 }
  0x21   :  { %472 = vmatpush3.bf16.msra.mxu1 %v471_v32 }
  0x22   :  { %490 = vmatpush3.bf16.msra.mxu0 %v489_v50 }
  0x23   :  { %491 = vmatprep.subr.bf16.mxu0 %v525_v3 }
  0x26   :  { %493 = vmatpush3.bf16.msra.mxu0 %v492_v59 }
  0x27   :  { %494 = vmatprep.subr.bf16.mxu0 %v525_v3  ;;  %v322_v3 = vld [vmem:[%s728_s6] ss:$0 sm:$0xff] }
  0x2a   :  { %496 = vmatpush3.bf16.msra.mxu0 %v495_v62 }
  0xde   :  { %v109_v52 = vpop.f32.mrb[0].mxu0 }
  0xdf   :  { %v110_v53 = vadd.f32 %v319_v51, %v109_v52  ;;  %v372_v54 = vpop.f32.mrb[1].mxu0 }
  0xe1   :  { %v113_v55 = vmul.f32 0.01, %v110_v53 }
  0xe3   :  { %v114_v56 = vmax.f32 %v110_v53, %v113_v55 }
  0xe5   :  { %406 = vmatmul.mubr.f32.vlgmr.msra.gmra.mrb[0].mxu1 %v114_v56 }
 0x1b8   :  { %v204_v0 = vpop.f32.mrb[0].mxu1 }
 0x1b9   :  { %v205_v1 = vadd.f32 %v321_v63, %v204_v0  ;;  %v407_v2 = vpop.f32.mrb[1].mxu1 }
 0x1bb   :  { %v208_v4 = vmul.f32 0.01, %v205_v1 }
 0x1bd   :  { %v209_v5 = vmax.f32 %v205_v1, %v208_v4 }
 0x1bf   :  { %441 = vmatmul.mubr.f32.vlgmr.msra.gmra.mrb[2].mxu0 %v209_v5 }
 0x292   :  { %v299_v6 = vpop.f32.mrb[2].mxu0 }
 0x293   :  { %v300_v7 = vadd.f32 %v322_v3, %v299_v6  ;;  %v442_v8 = vpop.f32.mrb[3].mxu0 }
 0x295   :  { %304 = vst.msk [vmem:[#allocation2] sm:$0xff] %vm303_vm2, %v300_v7 }
 0x296   :  { %512 = shalt.err (!%p509_p4)
}
 0x297   :  { %s513_s29 = scalar_lea.hbm %s729_s7, 128 }
 0x298   :  { %p514_p5 = scmp.ne.s32.totalorder %s729_s7, %s513_s29  ;;  %p517_p6 = scmp.lt.u32.totalorder %s513_s29, %s729_s7 }
 0x29a   :  { %p519_p7 = pnand %p517_p6, %p514_p5 }
 0x29c   :  { %522 = shalt.err (!%p519_p7)
}
 0x29d   :  { %314 = dma.vmem_to_hbm [thread:$0]  %s312_s27, 128, %s729_s7, [#allocation3]  }
 0x29e   :  { %523 = dma.done.wait [#allocation3], 128  }
 0x29f   :  { %524 = vsyncadd [#allocation3], 4294967168 }
 0x2a0   :  { %318 = vsyncpa [#allocation3], 1 }

</bundles_post_ra>
